<compile_context>
chip_gen: v7x
topology: tpu7x:2x2x1
jax: 0.10.0
libtpu: 0.0.40
codegen_flags: <defaults>
</compile_context>

<pallas_src>
import functools
import math

import jax
import jax.numpy as jnp
from jax import lax
from jax.experimental import pallas as pl
from jax.experimental.pallas import tpu as pltpu


# ----------------------------------------------------------------------------
# Tiling / hardware configuration
# ----------------------------------------------------------------------------

def _round_up(v, m):
    return ((v + m - 1) // m) * m


def _pick_tile(dim, desired, align):
    """Pick a tile size (multiple of `align`) and the padded dim it divides.

    Idempotent on already-padded dims, so init-time padding (weights) and
    call-time tiling (activations) always agree.
    """
    tile = desired if dim >= desired else _round_up(dim, align)
    return tile, _round_up(dim, tile)


def _maybe_split_m(tm, Mp, other_parallel_blocks):
    """Halve the M tile when the (i, j) parallel grid would otherwise have a
    single block, so both v7x TensorCores get work (megacore sharding needs
    >= 2 parallel blocks).  Halving never changes the padded dim Mp."""
    if other_parallel_blocks * (Mp // tm) < 2 and tm % 32 == 0 and tm >= 64:
        return tm // 2
    return tm


@functools.lru_cache(maxsize=None)
def _hw_config():
    """Generation-aware tile sizes and VMEM budget.

    v6e: 128 MiB VMEM & highest compute/BW ratio -> biggest tiles, ~96 MiB.
    v7x: 64 MiB VMEM per TensorCore -> 512x512 tiles, ~48 MiB (headroom for
         compiler scratch / semaphores).
    v5e / unknown: 128 MiB VMEM, 128-granular MXU -> 512x512, 64 MiB.
    """
    kind = ""
    try:
        kind = jax.devices()[0].device_kind.lower()
    except Exception:
        pass
    if "v6" in kind:
        return {"tm": 512, "tn": 1024, "tk": 512, "vmem": 96 * 2**20}
    if "v7" in kind:
        return {"tm": 512, "tn": 512, "tk": 512, "vmem": 48 * 2**20}
    return {"tm": 512, "tn": 512, "tk": 512, "vmem": 64 * 2**20}


# ----------------------------------------------------------------------------
# Kernels
# ----------------------------------------------------------------------------
# Invariant for all three: the reduction axis is the innermost ("arbitrary")
# grid axis and the output block index is constant across it, so init /
# epilogue via pl.when on the innermost program_id is correct.

def _mm_bias_kernel_f32(x_ref, w_ref, b_ref, o_ref):
    """y = x @ w + b, f32 output: accumulate directly into o_ref (no scratch)."""
    k = pl.program_id(2)

    @pl.when(k == 0)
    def _init():
        o_ref[...] = jnp.zeros_like(o_ref)

    o_ref[...] += jnp.dot(
        x_ref[...].astype(jnp.bfloat16), w_ref[...],
        preferred_element_type=jnp.float32)

    @pl.when(k == pl.num_programs(2) - 1)
    def _epilogue():
        o_ref[...] += b_ref[...]          # bias added exactly once


def _mm_bias_kernel_acc(x_ref, w_ref, b_ref, o_ref, acc_ref):
    """Same as above for narrow output dtypes: f32 scratch, cast in epilogue."""
    k = pl.program_id(2)

    @pl.when(k == 0)
    def _init():
        acc_ref[...] = jnp.zeros_like(acc_ref)

    acc_ref[...] += jnp.dot(
        x_ref[...].astype(jnp.bfloat16), w_ref[...],
        preferred_element_type=jnp.float32)

    @pl.when(k == pl.num_programs(2) - 1)
    def _epilogue():
        o_ref[...] = (acc_ref[...] + b_ref[...]).astype(o_ref.dtype)


def _mm_nt_kernel_f32(g_ref, w_ref, o_ref):
    """dx tile += g_tile @ w_tile^T (contract the N axis of both).  The
    "transpose" happens inside dot_general on the MXU/XLU path — no HBM
    transpose of W is ever materialized."""
    n = pl.program_id(2)

    @pl.when(n == 0)
    def _init():
        o_ref[...] = jnp.zeros_like(o_ref)

    o_ref[...] += lax.dot_general(
        g_ref[...].astype(jnp.bfloat16), w_ref[...],
        (((1,), (1,)), ((), ())),
        preferred_element_type=jnp.float32)


def _mm_tn_db_kernel(x_ref, g_ref, dw_ref, db_ref, acc_ref):
    """dW tile += x_tile^T @ g_tile (contract the M axis of both), with
    db = sum(g, axis=0) fused as a (1, tn) accumulator.

    grid = (Np//tn, Kp//tk, Mp//tm): j outermost so the db block (0, j) stays
    resident across the whole (i, m) sub-loop and is never revisited; db only
    accumulates on the i == 0 pass (its block does not depend on i)."""
    i = pl.program_id(1)   # K block
    m = pl.program_id(2)   # M block (reduction axis)

    @pl.when(m == 0)
    def _init():
        acc_ref[...] = jnp.zeros_like(acc_ref)

    acc_ref[...] += lax.dot_general(
        x_ref[...].astype(jnp.bfloat16), g_ref[...].astype(jnp.bfloat16),
        (((0,), (0,)), ((), ())),
        preferred_element_type=jnp.float32)

    @pl.when((i == 0) & (m == 0))
    def _db_init():
        db_ref[...] = jnp.zeros_like(db_ref)

    @pl.when(i == 0)
    def _db_acc():
        db_ref[...] += jnp.sum(g_ref[...].astype(jnp.float32), axis=0,
                               keepdims=True)

    @pl.when(m == pl.num_programs(2) - 1)
    def _epilogue():
        dw_ref[...] = acc_ref[...].astype(dw_ref.dtype)


# ----------------------------------------------------------------------------
# pallas_call wrappers
# ----------------------------------------------------------------------------

def _matmul_bias_pallas(x2d, w, b, *, out_dtype=None):
    """y = x2d @ w + b.

    x2d: (M, K) any float dtype (cast to bf16 per-tile inside the kernel).
    w:   (K', N) with K <= K' — ideally already bf16 and padded to tile
         multiples, in which case no pad/cast HBM pass happens here.
    b:   (1, N) (or (N,)) f32.
    Returns (M, N) in out_dtype (default x2d.dtype).
    """
    M, K = x2d.shape
    Kw, N = w.shape
    if b.ndim == 1:
        b = b.reshape(1, -1)
    out_dtype = jnp.dtype(out_dtype or x2d.dtype)
    cfg = _hw_config()

    tk, Kp = _pick_tile(Kw, cfg["tk"], 128)
    tn, Np = _pick_tile(N, cfg["tn"], 128)
    tm, Mp = _pick_tile(M, cfg["tm"], 16)      # 16: bf16 sublane packing (v5e)
    tm = _maybe_split_m(tm, Mp, Np // tn)

    # Pads are skipped entirely when shapes are already tile-aligned.
    xp = x2d if (Mp == M and Kp == K) else jnp.pad(
        x2d, ((0, Mp - M), (0, Kp - K)))
    wp = w if (w.dtype == jnp.bfloat16 and w.shape == (Kp, Np)) else jnp.pad(
        w, ((0, Kp - Kw), (0, Np - N))).astype(jnp.bfloat16)
    bp = b if (b.dtype == jnp.float32 and b.shape == (1, Np)) else jnp.pad(
        b.astype(jnp.float32), ((0, 0), (0, Np - N)))

    grid = (Mp // tm, Np // tn, Kp // tk)
    f32_out = out_dtype == jnp.float32
    kernel = _mm_bias_kernel_f32 if f32_out else _mm_bias_kernel_acc
    scratch = [] if f32_out else [pltpu.VMEM((tm, tn), jnp.float32)]

    cost = pl.CostEstimate(
        flops=2 * Mp * Np * Kp,
        transcendentals=0,
        bytes_accessed=(Mp * Kp * xp.dtype.itemsize + Kp * Np * 2 + Np * 4
                        + Mp * Np * out_dtype.itemsize))

    yp = pl.pallas_call(
        kernel,
        out_shape=jax.ShapeDtypeStruct((Mp, Np), out_dtype),
        grid_spec=pltpu.PrefetchScalarGridSpec(
            num_scalar_prefetch=0,
            grid=grid,
            in_specs=[
                pl.BlockSpec((tm, tk), lambda i, j, k: (i, k)),
                pl.BlockSpec((tk, tn), lambda i, j, k: (k, j)),
                pl.BlockSpec((1, tn), lambda i, j, k: (0, j)),
            ],
            out_specs=pl.BlockSpec((tm, tn), lambda i, j, k: (i, j)),
            scratch_shapes=scratch,
        ),
        compiler_params=pltpu.CompilerParams(
            dimension_semantics=("parallel", "parallel", "arbitrary"),
            vmem_limit_bytes=cfg["vmem"],
        ),
        cost_estimate=cost,
    )(xp, wp, bp)

    return yp if (Mp == M and Np == N) else yp[:M, :N]


def _matmul_nt_pallas(g, w, *, out_dtype=None):
    """dx = g @ w^T without materializing w^T in HBM.

    g: (M, N); w: (K, N') with N <= N' (ideally pre-padded bf16).
    Returns (M, K); f32 accumulation, cast only if out_dtype differs.
    """
    M, N = g.shape
    K, Nw = w.shape
    cfg = _hw_config()

    tn, Np = _pick_tile(Nw, cfg["tn"], 128)
    tk, Kp = _pick_tile(K, cfg["tk"], 128)
    tm, Mp = _pick_tile(M, cfg["tm"], 16)
    tm = _maybe_split_m(tm, Mp, Kp // tk)

    gp = g if (Mp == M and Np == N) else jnp.pad(g, ((0, Mp - M), (0, Np - N)))
    wp = w if (w.dtype == jnp.bfloat16 and w.shape == (Kp, Np)) else jnp.pad(
        w, ((0, Kp - K), (0, Np - Nw))).astype(jnp.bfloat16)

    grid = (Mp // tm, Kp // tk, Np // tn)
    cost = pl.CostEstimate(
        flops=2 * Mp * Kp * Np,
        transcendentals=0,
        bytes_accessed=(Mp * Np * gp.dtype.itemsize + Kp * Np * 2
                        + Mp * Kp * 4))

    dxp = pl.pallas_call(
        _mm_nt_kernel_f32,
        out_shape=jax.ShapeDtypeStruct((Mp, Kp), jnp.float32),
        grid_spec=pltpu.PrefetchScalarGridSpec(
            num_scalar_prefetch=0,
            grid=grid,
            in_specs=[
                pl.BlockSpec((tm, tn), lambda i, j, n: (i, n)),
                pl.BlockSpec((tk, tn), lambda i, j, n: (j, n)),
            ],
            out_specs=pl.BlockSpec((tm, tk), lambda i, j, n: (i, j)),
        ),
        compiler_params=pltpu.CompilerParams(
            dimension_semantics=("parallel", "parallel", "arbitrary"),
            vmem_limit_bytes=cfg["vmem"],
        ),
        cost_estimate=cost,
    )(gp, wp)

    out = dxp if (Mp == M and Kp == K) else dxp[:M, :K]
    if out_dtype is not None and out.dtype != jnp.dtype(out_dtype):
        # TODO(synk): add a scratch-accumulator NT variant to avoid this extra
        # cast pass when activations are bf16 (f32 path — the common case —
        # never hits it).
        out = out.astype(out_dtype)
    return out


def _matmul_tn_db_pallas(x2d, g, *, dw_dtype=None):
    """dW = x2d^T @ g and db = sum(g, axis=0), fused into one kernel, without
    materializing x2d^T in HBM.

    x2d: (M, K); g: (M, N).  Returns (dW (K, N), db (1, N) f32).
    """
    M, K = x2d.shape
    Mg, N = g.shape
    dw_dtype = jnp.dtype(dw_dtype or x2d.dtype)
    cfg = _hw_config()

    tk, Kp = _pick_tile(K, cfg["tk"], 128)
    tn, Np = _pick_tile(N, cfg["tn"], 128)
    tm, Mp = _pick_tile(M, cfg["tm"], 16)

    xp = x2d if (Mp == M and Kp == K) else jnp.pad(
        x2d, ((0, Mp - M), (0, Kp - K)))
    gp = g if (Mp == M and Np == N) else jnp.pad(
        g, ((0, Mp - M), (0, Np - N)))

    grid = (Np // tn, Kp // tk, Mp // tm)   # (j, i, m), m = reduction
    cost = pl.CostEstimate(
        flops=2 * Mp * Kp * Np,
        transcendentals=0,
        bytes_accessed=(Mp * Kp * xp.dtype.itemsize + Mp * Np * gp.dtype.itemsize
                        + Kp * Np * dw_dtype.itemsize + Np * 4))

    dwp, dbp = pl.pallas_call(
        _mm_tn_db_kernel,
        out_shape=(jax.ShapeDtypeStruct((Kp, Np), dw_dtype),
                   jax.ShapeDtypeStruct((1, Np), jnp.float32)),
        grid_spec=pltpu.PrefetchScalarGridSpec(
            num_scalar_prefetch=0,
            grid=grid,
            in_specs=[
                pl.BlockSpec((tm, tk), lambda j, i, m: (m, i)),
                pl.BlockSpec((tm, tn), lambda j, i, m: (m, j)),
            ],
            out_specs=[
                pl.BlockSpec((tk, tn), lambda j, i, m: (i, j)),
                pl.BlockSpec((1, tn), lambda j, i, m: (0, j)),
            ],
            scratch_shapes=[pltpu.VMEM((tk, tn), jnp.float32)],
        ),
        compiler_params=pltpu.CompilerParams(
            # i is NOT parallel: the fused db accumulation runs only on i == 0
            # and must see every (i == 0, m) iteration on one core.
            dimension_semantics=("parallel", "arbitrary", "arbitrary"),
            vmem_limit_bytes=cfg["vmem"],
        ),
        cost_estimate=cost,
    )(xp, gp)

    dw = dwp if (Kp == K and Np == N) else dwp[:K, :N]
    db = dbp if Np == N else dbp[:, :N]
    return dw, db


# ----------------------------------------------------------------------------
# Differentiable linear op on fully padded operands (padding / slicing lives
# outside the custom_vjp, so every kernel sees tile-aligned shapes).
# ----------------------------------------------------------------------------

@jax.custom_vjp
def _linear_padded(xp, w_p, b_p):
    return _matmul_bias_pallas(xp, w_p, b_p)


def _linear_padded_fwd(xp, w_p, b_p):
    return _matmul_bias_pallas(xp, w_p, b_p), (xp, w_p)


def _linear_padded_bwd(res, g):
    xp, w_p = res
    dx = _matmul_nt_pallas(g, w_p, out_dtype=xp.dtype)       # g @ W^T
    dw, db = _matmul_tn_db_pallas(xp, g, dw_dtype=w_p.dtype)  # x^T @ g, sum(g)
    return dx, dw, db


_linear_padded.defvjp(_linear_padded_fwd, _linear_padded_bwd)


# ----------------------------------------------------------------------------
# Module mirrors
# ----------------------------------------------------------------------------

class CheckpointedLayer:
    """JAX mirror of tortoise CheckpointedLayer.  The torch forward only
    asserts that kwarg tensors do not require grad and then calls the wrapped
    module, so the forward here calls the wrapped module directly.  remat is
    intentionally not applied: for a single wrapped linear it saves nothing
    and would re-run the forward Pallas matmul in the backward."""

    def __init__(self, wrap):
        self.wrap = wrap

    def __call__(self, x, *args, **kwargs):
        # TODO(synk): torch asserts kwarg tensors don't require grad; JAX has
        # no requires_grad flag, so kwargs are simply closed over.
        partial = functools.partial(self.wrap, **kwargs)
        return partial(x, *args)


class PallasLinear:
    """The concrete wrapped module: y = x @ W^T + b (torch convention).

    The weight is transposed to (H_in, H_out), padded to tile multiples and
    cast to bf16 ONCE at init; the bias is padded/reshaped to (1, Np) f32 at
    init.  Per-call work is therefore only (optional) activation padding and
    the Pallas matmul (bf16 MXU operands, f32 accumulation)."""

    def __init__(self, hidden, key):
        k_w, k_b = jax.random.split(key)
        bound = 1.0 / math.sqrt(hidden)
        w_torch = jax.random.uniform(k_w, (hidden, hidden), jnp.float32,
                                     -bound, bound)   # torch stores (out, in)
        bias = jax.random.uniform(k_b, (hidden,), jnp.float32, -bound, bound)

        self.hidden = hidden
        self.weight = jnp.asarray(w_torch.T)   # (H_in, H_out), f32 reference
        self.bias = bias

        cfg = _hw_config()
        _, kp = _pick_tile(hidden, cfg["tk"], 128)
        _, np_ = _pick_tile(hidden, cfg["tn"], 128)
        self._w_p = jnp.pad(self.weight,
                            ((0, kp - hidden), (0, np_ - hidden))
                            ).astype(jnp.bfloat16)                  # (Kp, Np)
        self._b_p = jnp.pad(bias, (0, np_ - hidden)
                            ).astype(jnp.float32).reshape(1, np_)   # (1, Np)

    def __call__(self, x):
        B, S, H = x.shape
        M = B * S
        cfg = _hw_config()
        _, Mp = _pick_tile(M, cfg["tm"], 16)
        Kp, Np = self._w_p.shape

        x2d = x.reshape(M, H)
        if Mp != M or Kp != H:
            x2d = jnp.pad(x2d, ((0, Mp - M), (0, Kp - H)))
        y = _linear_padded(x2d, self._w_p, self._b_p)   # (Mp, Np)
        if Mp != M or Np != H:
            y = y[:M, :H]
        return y.reshape(B, S, H)


# ----------------------------------------------------------------------------
# Demo / correctness checks
# ----------------------------------------------------------------------------

if __name__ == "__main__":
    key = jax.random.PRNGKey(0)
    k_x, k_p, k_a, k_w2, k_g = jax.random.split(key, 5)

    # Small shapes consistent with the module (padded internally to tiles).
    B, S, H = 2, 8, 32
    x = jax.random.normal(k_x, (B, S, H), jnp.float32)

    wrapped = PallasLinear(H, k_p)
    layer = CheckpointedLayer(wrapped)

    fwd = jax.jit(lambda xx: layer(xx))
    out = jax.block_until_ready(fwd(x))
    ref = x @ wrapped.weight + wrapped.bias
    assert out.shape == (B, S, H)
    assert jnp.allclose(out, ref, atol=2e-2, rtol=2e-2), float(
        jnp.max(jnp.abs(out - ref)))

    # Backward through the custom VJP (jitted so unused dW/db kernels DCE).
    grad_fn = jax.jit(jax.grad(lambda xx: layer(xx).sum()))
    gx = jax.block_until_ready(grad_fn(x))
    gx_ref = jax.grad(lambda xx: (xx @ wrapped.weight + wrapped.bias).sum())(x)
    assert gx.shape == x.shape
    assert jnp.allclose(gx, gx_ref, atol=5e-2, rtol=5e-2), float(
        jnp.max(jnp.abs(gx - gx_ref)))

    # Multi-block sanity checks: >1 block on every grid axis, padding,
    # reduction accumulation, bias / db epilogues, for all three kernels.
    M2 = K2 = N2 = 1280
    a = jax.random.normal(k_a, (M2, K2), jnp.float32)
    w2 = jax.random.normal(k_w2, (K2, N2), jnp.float32) * 0.05
    b2 = (jnp.arange(N2, dtype=jnp.float32) * 1e-3).reshape(1, N2)
    g2 = jax.random.normal(k_g, (M2, N2), jnp.float32) * 0.1

    # Forward: y = a @ w2 + b2
    y2 = jax.block_until_ready(_matmul_bias_pallas(a, w2, b2))
    y2_ref = jnp.dot(a.astype(jnp.bfloat16), w2.astype(jnp.bfloat16),
                     preferred_element_type=jnp.float32) + b2
    assert jnp.allclose(y2, y2_ref, atol=2e-2, rtol=2e-2), float(
        jnp.max(jnp.abs(y2 - y2_ref)))

    # dx = g2 @ w2^T (NT kernel, no HBM transpose of W).
    dx2 = jax.block_until_ready(_matmul_nt_pallas(g2, w2))
    dx2_ref = jnp.dot(g2.astype(jnp.bfloat16), w2.T.astype(jnp.bfloat16),
                      preferred_element_type=jnp.float32)
    assert jnp.allclose(dx2, dx2_ref, atol=2e-2, rtol=2e-2), float(
        jnp.max(jnp.abs(dx2 - dx2_ref)))

    # dW = a^T @ g2 with fused db (TN kernel, no HBM transpose of x).
    dw2, db2 = _matmul_tn_db_pallas(a, g2, dw_dtype=jnp.float32)
    jax.block_until_ready((dw2, db2))
    dw2_ref = jnp.dot(a.T.astype(jnp.bfloat16), g2.astype(jnp.bfloat16),
                      preferred_element_type=jnp.float32)
    db2_ref = jnp.sum(g2, axis=0, keepdims=True)
    assert jnp.allclose(dw2, dw2_ref, atol=5e-2, rtol=5e-2), float(
        jnp.max(jnp.abs(dw2 - dw2_ref)))
    assert jnp.allclose(db2, db2_ref, atol=1e-2, rtol=1e-3), float(
        jnp.max(jnp.abs(db2 - db2_ref)))

    print("KERNEL_OK")
</pallas_src>

<mosaic_0001>
module attributes {stable_mosaic.version = 11 : i64} {
  func.func @_mm_bias_kernel_f32(%arg0: i32, %arg1: i32, %arg2: i32, %arg3: memref<16x128xf32, #tpu.memory_space<vmem>>, %arg4: memref<128x128xbf16, #tpu.memory_space<vmem>>, %arg5: memref<1x128xf32, #tpu.memory_space<vmem>>, %arg6: memref<16x128xf32, #tpu.memory_space<vmem>>) attributes {dimension_semantics = [#tpu.dimension_semantics<parallel>, #tpu.dimension_semantics<parallel>, #tpu.dimension_semantics<arbitrary>], iteration_bounds = array<i64: 1, 1, 1>, scalar_prefetch = 0 : i64, scratch_operands = 0 : i64, tpu.core_type = #tpu.core_type<tc>, window_params = [{transform_indices = @transform_0, window_bounds = array<i64: 16, 128>}, {transform_indices = @transform_1, window_bounds = array<i64: 128, 128>}, {transform_indices = @transform_2, window_bounds = array<i64: 1, 128>}, {transform_indices = @transform_3, window_bounds = array<i64: 16, 128>}]} {
    %c0_i32 = arith.constant 0 : i32
    %0 = arith.cmpi eq, %arg2, %c0_i32 : i32
    %1 = arith.extui %0 : i1 to i32
    %c0_i32_0 = arith.constant 0 : i32
    %2 = arith.cmpi ne, %1, %c0_i32_0 : i32
    scf.if %2 {
      %cst_10 = arith.constant 0.000000e+00 : f32
      %13 = vector.broadcast %cst_10 : f32 to vector<16x128xf32>
      %c0_11 = arith.constant 0 : index
      %c0_12 = arith.constant 0 : index
      %14 = vector.load %arg6[%c0_11, %c0_12] : memref<16x128xf32, #tpu.memory_space<vmem>>, vector<16x128xf32>
      tpu.vector_store %arg6[%c0_11, %c0_12], %13 {strides = array<i32>} : memref<16x128xf32, #tpu.memory_space<vmem>>, vector<16x128xf32>,
    } else {
    }
    %c0 = arith.constant 0 : index
    %c0_1 = arith.constant 0 : index
    %3 = vector.load %arg6[%c0, %c0_1] : memref<16x128xf32, #tpu.memory_space<vmem>>, vector<16x128xf32>
    %c0_2 = arith.constant 0 : index
    %c0_3 = arith.constant 0 : index
    %4 = vector.load %arg3[%c0_2, %c0_3] : memref<16x128xf32, #tpu.memory_space<vmem>>, vector<16x128xf32>
    %5 = arith.truncf %4 : vector<16x128xf32> to vector<16x128xbf16>
    %c0_4 = arith.constant 0 : index
    %c0_5 = arith.constant 0 : index
    %6 = vector.load %arg4[%c0_4, %c0_5] : memref<128x128xbf16, #tpu.memory_space<vmem>>, vector<128x128xbf16>
    %cst = arith.constant dense<0.000000e+00> : vector<16x128xf32>
    %7 = tpu.matmul %5, %6, %cst {dimension_numbers = #tpu.dot_dimension_numbers<[1], [0], [0], [1], [0, 0, 1, 1], [], []>} : vector<16x128xbf16>, vector<128x128xbf16>, vector<16x128xf32> -> vector<16x128xf32>
    %8 = arith.addf %3, %7 : vector<16x128xf32>
    %c0_6 = arith.constant 0 : index
    %c0_7 = arith.constant 0 : index
    %9 = vector.load %arg6[%c0_6, %c0_7] : memref<16x128xf32, #tpu.memory_space<vmem>>, vector<16x128xf32>
    tpu.vector_store %arg6[%c0_6, %c0_7], %8 {strides = array<i32>} : memref<16x128xf32, #tpu.memory_space<vmem>>, vector<16x128xf32>,
    %c0_i32_8 = arith.constant 0 : i32
    %10 = arith.cmpi eq, %arg2, %c0_i32_8 : i32
    %11 = arith.extui %10 : i1 to i32
    %c0_i32_9 = arith.constant 0 : i32
    %12 = arith.cmpi ne, %11, %c0_i32_9 : i32
    scf.if %12 {
      %c0_10 = arith.constant 0 : index
      %c0_11 = arith.constant 0 : index
      %13 = vector.load %arg6[%c0_10, %c0_11] : memref<16x128xf32, #tpu.memory_space<vmem>>, vector<16x128xf32>
      %c0_12 = arith.constant 0 : index
      %c0_13 = arith.constant 0 : index
      %14 = vector.load %arg5[%c0_12, %c0_13] : memref<1x128xf32, #tpu.memory_space<vmem>>, vector<1x128xf32>
      %15 = vector.broadcast %14 : vector<1x128xf32> to vector<16x128xf32>
      %16 = arith.addf %13, %15 : vector<16x128xf32>
      %c0_14 = arith.constant 0 : index
      %c0_15 = arith.constant 0 : index
      %17 = vector.load %arg6[%c0_14, %c0_15] : memref<16x128xf32, #tpu.memory_space<vmem>>, vector<16x128xf32>
      tpu.vector_store %arg6[%c0_14, %c0_15], %16 {strides = array<i32>} : memref<16x128xf32, #tpu.memory_space<vmem>>, vector<16x128xf32>,
    } else {
    }
    return
  }
  func.func @transform_0(%arg0: i32, %arg1: i32, %arg2: i32) -> (i32, i32) {
    %c0_i32 = arith.constant 0 : i32
    return %arg0, %arg2 : i32, i32
  }
  func.func @transform_1(%arg0: i32, %arg1: i32, %arg2: i32) -> (i32, i32) {
    %c0_i32 = arith.constant 0 : i32
    return %arg2, %arg1 : i32, i32
  }
  func.func @transform_2(%arg0: i32, %arg1: i32, %arg2: i32) -> (i32, i32) {
    %c0_i32 = arith.constant 0 : i32
    %c0_i32_0 = arith.constant 0 : i32
    return %c0_i32, %arg1 : i32, i32
  }
  func.func @transform_3(%arg0: i32, %arg1: i32, %arg2: i32) -> (i32, i32) {
    %c0_i32 = arith.constant 0 : i32
    return %arg0, %arg1 : i32, i32
  }
}

</mosaic_0001>

<bundles_post_ra>
// kernel: _lambda_.1
= control target key start
LH: loop header
LB: loop body
LE: loop exit
PB: predicated region body
PF: predicated region fallthrough
CT: control target
= control target key end

     0   :  { %8 = vsyncpa [#allocation3], 0  ;;  %s443_s0 = inlined_call_operand.hbm [shape: f32[16,128], index: 0, kind: input, shape index: {}]   ;;  %s444_s1 = inlined_call_operand.hbm [shape: bf16[128,128], index: 1, kind: input, shape index: {}]   ;;  %s445_s2 = inlined_call_operand.hbm [shape: f32[1,128], index: 2, kind: input, shape index: {}]   ;;  %s446_s3 = inlined_call_operand.hbm [shape: f32[16,128], index: 3, kind: output, shape index: {}]  }
   0x1   :  { %9 = vsyncpa [#allocation6], 0 }
   0x2   :  { %10 = vsyncpa [#allocation4], 0  ;;  %s359_s12 = smov [#allocation5]   ;;  %s265_s16 = scalar_lea.hbm %s444_s1, 1024 }
   0x3   :  { %s28_s13 = sshll.u32 %s359_s12, 4  ;;  %p266_p0 = scmp.ne.s32.totalorder %s444_s1, %s265_s16  ;;  %s29_s13 = int_to_ptr.vmem [resolvable:$true] %s28_s13 }
   0x4   :  { %p269_p1 = scmp.lt.u32.totalorder %s265_s16, %s444_s1 }
   0x6   :  { %p271_p2 = pnand %p269_p1, %p266_p0 }
   0x8   :  { %274 = shalt.err (!%p271_p2)
}
   0x9   :  { %s275_s21 = scalar_lea.vmem %s29_s13, 1024  ;;  %p280_p4 = scmp.lt.s32.totalorder %s29_s13, %s29_s13 }
   0xa   :  { %p276_p3 = scmp.ne.s32.totalorder %s29_s13, %s275_s21  ;;  %p281_p5 = scmp.lt.s32.totalorder %s275_s21, %s275_s21 }
   0xc   :  { %p282_p6 = por %p281_p5, %p280_p4 }
   0xe   :  { %p283_p7 = pnand %p282_p6, %p276_p3 }
  0x10   :  { %286 = shalt.err (!%p283_p7)
}
  0x11   :  { %s360_s22 = smov 64   ;;  %s361_s23 = smov 4  }
  0x12   :  { %34 = dma.hbm_to_vmem [thread:$0]  %s444_s1, 1024, %s29_s13, [#allocation6], %s360_s22, %s360_s22, %s361_s23  }
  0x13   :  { %s362_s26 = smov [#allocation2]   ;;  %s287_s30 = scalar_lea.hbm %s443_s0, 256 }
  0x14   :  { %s16_s27 = sshll.u32 %s362_s26, 4  ;;  %p288_p8 = scmp.ne.s32.totalorder %s443_s0, %s287_s30  ;;  %s17_s27 = int_to_ptr.vmem [resolvable:$true] %s16_s27 }
  0x15   :  { %p291_p9 = scmp.lt.u32.totalorder %s287_s30, %s443_s0 }
  0x17   :  { %p293_p10 = pnand %p291_p9, %p288_p8 }
  0x19   :  { %296 = shalt.err (!%p293_p10)
}
  0x1a   :  { %s297_s8 = scalar_lea.vmem %s17_s27, 256  ;;  %p302_p12 = scmp.lt.s32.totalorder %s17_s27, %s17_s27 }
  0x1b   :  { %p298_p11 = scmp.ne.s32.totalorder %s17_s27, %s297_s8  ;;  %p303_p13 = scmp.lt.s32.totalorder %s297_s8, %s297_s8 }
  0x1d   :  { %p304_p0 = por %p303_p13, %p302_p12 }
  0x1f   :  { %p305_p1 = pnand %p304_p0, %p298_p11 }
  0x21   :  { %308 = shalt.err (!%p305_p1)
}
  0x22   :  { %s363_s1 = smov 128   ;;  %s364_s9 = smov 8  }
  0x23   :  { %22 = dma.hbm_to_vmem [thread:$0]  %s443_s0, 256, %s17_s27, [#allocation3], %s363_s1, %s363_s1, %s364_s9  }
  0x24   :  { %s365_s12 = smov [#allocation7]   ;;  %s309_s16 = scalar_lea.hbm %s445_s2, 16 }
  0x25   :  { %s41_s13 = sshll.u32 %s365_s12, 4  ;;  %p310_p2 = scmp.ne.s32.totalorder %s445_s2, %s309_s16  ;;  %s42_s13 = int_to_ptr.vmem [resolvable:$true] %s41_s13 }
  0x26   :  { %p313_p3 = scmp.lt.u32.totalorder %s309_s16, %s445_s2 }
  0x28   :  { %p315_p4 = pnand %p313_p3, %p310_p2 }
  0x2a   :  { %318 = shalt.err (!%p315_p4)
}
  0x2b   :  { %s319_s21 = scalar_lea.vmem %s42_s13, 16  ;;  %s323_s0 = scalar_lea.vmem %s42_s13, 32 }
  0x2c   :  { %p320_p5 = scmp.ne.s32.totalorder %s42_s13, %s319_s21  ;;  %p324_p6 = scmp.lt.s32.totalorder %s42_s13, %s42_s13 }
  0x2d   :  { %p325_p7 = scmp.lt.s32.totalorder %s323_s0, %s319_s21 }
  0x2f   :  { %p326_p8 = por %p325_p7, %p324_p6 }
  0x31   :  { %p327_p9 = pnand %p326_p8, %p320_p5 }
  0x33   :  { %330 = shalt.err (!%p327_p9)
}
  0x34   :  { %44 = dma.hbm_to_vmem [thread:$0]  %s445_s2, 16, %s42_s13, [#allocation6]  }
  0x35   :  { %353 = dma.done.wait [#allocation3], 256  }
  0x36   :  { %354 = vsyncadd [#allocation3], 4294967040 }
  0x37   :  { %355 = dma.done.wait [#allocation6], 1040  }
  0x38   :  { %356 = vsyncadd [#allocation6], 4294966256  ;;  %v366_v0 = vmov 0.0   ;;  %vm367_vm0 = vmmov 0   ;;  %v257_v1 = vld [vmem:[#allocation5] sm:$0xff]   ;;  %v258_v2 = vld [vmem:[#allocation5 + $0x8] sm:$0xff]  }
  0x39   :  { %227 = vmatprep.subr.bf16.mxu0 %v366_v0  ;;  %243 = vmatprep.mubr.msk.bf16.mxu0 %vm367_vm0, %v366_v0  ;;  %v259_v3 = vld [vmem:[#allocation5 + $0x10] sm:$0xff]   ;;  %v260_v4 = vld [vmem:[#allocation5 + $0x18] sm:$0xff]   ;;  %v261_v5 = vld [vmem:[#allocation5 + $0x20] sm:$0xff]   ;;  %s368_s2 = smov [#allocation8]  }
  0x3a   :  { %228 = vmatpush3.bf16.msra.mxu0 %v257_v1  ;;  %v262_v6 = vld [vmem:[#allocation5 + $0x28] sm:$0xff]   ;;  %v263_v7 = vld [vmem:[#allocation5 + $0x30] sm:$0xff]   ;;  %v264_v8 = vld [vmem:[#allocation5 + $0x38] sm:$0xff]   ;;  %s196_s24 = sshll.u32 %s368_s2, 4  ;;  %s197_s24 = int_to_ptr.vmem [resolvable:$true] %s196_s24 }
  0x3b   :  { %229 = vmatprep.subr.bf16.mxu0 %v366_v0  ;;  %v63_v9 = vld [vmem:[#allocation2] sm:$0xff]  ;;  %v64_v10 = vld [vmem:[#allocation2 + $0x8] sm:$0xff]  ;;  %v217_v13 = vld [vmem:[#allocation7] ss:$0 sm:$0xff]  ;;  %s331_s25 = scalar_lea.vmem %s197_s24, 256  ;;  %p336_p11 = scmp.lt.s32.totalorder %s197_s24, %s197_s24 }
  0x3c   :  { %v65_v11 = vpack.c.bf16 %v64_v10, %v63_v9  ;;  %p332_p10 = scmp.ne.s32.totalorder %s197_s24, %s331_s25  ;;  %p337_p12 = scmp.lt.s32.totalorder %s331_s25, %s331_s25 }
  0x3e   :  { %230 = vmatpush3.bf16.msra.mxu0 %v258_v2  ;;  %p338_p13 = por %p337_p12, %p336_p11 }
  0x3f   :  { %231 = vmatprep.subr.bf16.mxu0 %v366_v0 }
  0x40   :  { %p339_p0 = pnand %p338_p13, %p332_p10 }
  0x42   :  { %232 = vmatpush3.bf16.msra.mxu0 %v259_v3 }
  0x43   :  { %233 = vmatprep.subr.bf16.mxu0 %v366_v0 }
  0x46   :  { %234 = vmatpush3.bf16.msra.mxu0 %v260_v4 }
  0x47   :  { %235 = vmatprep.subr.bf16.mxu0 %v366_v0 }
  0x4a   :  { %236 = vmatpush3.bf16.msra.mxu0 %v261_v5 }
  0x4b   :  { %237 = vmatprep.subr.bf16.mxu0 %v366_v0 }
  0x4e   :  { %238 = vmatpush3.bf16.msra.mxu0 %v262_v6 }
  0x4f   :  { %239 = vmatprep.subr.bf16.mxu0 %v366_v0 }
  0x52   :  { %240 = vmatpush3.bf16.msra.mxu0 %v263_v7 }
  0x53   :  { %241 = vmatprep.subr.bf16.mxu0 %v366_v0 }
  0x56   :  { %242 = vmatpush3.bf16.msra.mxu0 %v264_v8 }
  0x59   :  { %244 = vmatmul.mubr.bf16.vlgmr.msra.gmra.mrb[0].mxu0 %v65_v11 }
 0x12c   :  { %v164_v12 = vpop.f32.mrb[0].mxu0 }
 0x12d   :  { %v245_v14 = vpop.f32.mrb[1].mxu0  ;;  %v187_v17 = vadd.f32 %v217_v13, %v164_v12 }
 0x12e   :  { %v167_v15 = vpop.f32.mrb[2].mxu0 }
 0x12f   :  { %v246_v16 = vpop.f32.mrb[3].mxu0  ;;  %v188_v18 = vadd.f32 %v217_v13, %v167_v15  ;;  %189 = vst [vmem:[#allocation8] sm:$0xff] %v187_v17 }
 0x131   :  { %190 = vst [vmem:[#allocation8 + $0x8] sm:$0xff] %v188_v18 }
 0x132   :  { %342 = shalt.err (!%p339_p0)
}
 0x133   :  { %s343_s28 = scalar_lea.hbm %s446_s3, 256 }
 0x134   :  { %p344_p1 = scmp.ne.s32.totalorder %s446_s3, %s343_s28  ;;  %p347_p2 = scmp.lt.u32.totalorder %s343_s28, %s446_s3 }
 0x136   :  { %p349_p3 = pnand %p347_p2, %p344_p1 }
 0x138   :  { %352 = shalt.err (!%p349_p3)
}
 0x139   :  { %202 = dma.vmem_to_hbm [thread:$0]  %s197_s24, 256, %s446_s3, [#allocation4], %s363_s1, %s363_s1, %s364_s9  }
 0x13a   :  { %357 = dma.done.wait [#allocation4], 256  }
 0x13b   :  { %358 = vsyncadd [#allocation4], 4294967040 }
 0x13c   :  { %206 = vsyncpa [#allocation3], 1 }
 0x13d   :  { %207 = vsyncpa [#allocation6], 1 }
 0x13e   :  { %208 = vsyncpa [#allocation4], 1 }

</bundles_post_ra>
